<compile_context>
chip_gen: v6e
topology: v6e:2x2x1
jax: 0.10.0
libtpu: 0.0.40
codegen_flags: <defaults>
</compile_context>

<pallas_src>
import jax
import jax.numpy as jnp
from jax.experimental import pallas as pl
from jax.experimental.pallas import tpu as pltpu

_LANE = 128      # lane width (last dim)
_SUBLANE = 8     # sublane width (second-to-last dim)


def _round_up(n, m):
    return ((n + m - 1) // m) * m


def _sigmoid(x):
    # Single EUP transcendental per element (tanh) instead of exp + reciprocal.
    return 0.5 * jnp.tanh(0.5 * x) + 0.5


# --------------------------------------------------------------------------
# Kernels
# --------------------------------------------------------------------------

def _mlp_kernel_resident(x_ref, w1_ref, b1_ref, w2_ref, b2_ref, o_ref):
    """Both weight matrices VMEM-resident; batch tiles streamed."""
    x = x_ref[...].astype(w1_ref.dtype)                 # in-kernel bf16 cast
    h = jnp.dot(x, w1_ref[...], preferred_element_type=jnp.float32)
    h = _sigmoid(h + b1_ref[...])                       # (tm, Hp) + (1, Hp), f32
    y = jnp.dot(h.astype(w2_ref.dtype), w2_ref[...],
                preferred_element_type=jnp.float32)
    o_ref[...] = _sigmoid(y + b2_ref[...]).astype(o_ref.dtype)


def _mlp_kernel_tiled(x_ref, w1_ref, b1_ref, w2_ref, b2_ref, o_ref, acc_ref):
    """Hidden dim tiled: accumulate layer-2 partial products over hidden chunks."""
    k = pl.program_id(1)

    @pl.when(k == 0)
    def _():
        acc_ref[...] = jnp.zeros_like(acc_ref)

    x = x_ref[...].astype(w1_ref.dtype)
    h = jnp.dot(x, w1_ref[...], preferred_element_type=jnp.float32)
    h = _sigmoid(h + b1_ref[...])                       # (tm, th) hidden chunk
    acc_ref[...] += jnp.dot(h.astype(w2_ref.dtype), w2_ref[...],
                            preferred_element_type=jnp.float32)

    @pl.when(k == pl.num_programs(1) - 1)
    def _():
        o_ref[...] = _sigmoid(acc_ref[...] + b2_ref[...]).astype(o_ref.dtype)


# --------------------------------------------------------------------------
# Parameter preparation (one-time, hoisted out of the call path)
# --------------------------------------------------------------------------

def prepare_mlp_params(w1, b1, w2, b2, *, mxu_dtype=jnp.bfloat16, lane_pad=_LANE):
    """PyTorch layout in:  w1 (H, IN), b1 (H,), w2 (OUT, H), b2 (OUT,).

    Kernel layout out: W1T (IN, Hp) bf16, b1 (1, Hp) f32,
                       W2T (Hp, OUTp) bf16, b2 (1, OUTp) f32.
    Hidden/output dims are zero-padded to `lane_pad`.  Padding is inert:
    padded W2T rows are zero, so sigmoid(0)=0.5 in padded hidden columns never
    reaches real outputs.  The input dim is NOT padded: x is streamed at its
    true width and cast inside the kernel.
    """
    hid, in_dim = w1.shape
    out_dim = w2.shape[0]
    hid_p = _round_up(hid, lane_pad)
    out_p = _round_up(out_dim, lane_pad)

    w1t = jnp.zeros((in_dim, hid_p), mxu_dtype).at[:, :hid].set(w1.T.astype(mxu_dtype))
    w2t = jnp.zeros((hid_p, out_p), mxu_dtype).at[:hid, :out_dim].set(
        w2.T.astype(mxu_dtype))
    b1r = jnp.zeros((1, hid_p), jnp.float32).at[0, :hid].set(b1.astype(jnp.float32))
    b2r = jnp.zeros((1, out_p), jnp.float32).at[0, :out_dim].set(b2.astype(jnp.float32))
    return w1t, b1r, w2t, b2r, out_dim


# --------------------------------------------------------------------------
# Host-side helpers
# --------------------------------------------------------------------------

def _vmem_capacity_bytes():
    try:
        cap = int(pltpu.get_tpu_info().vmem_capacity_bytes)
        if cap > 0:
            return cap
    except Exception:
        pass
    return 64 << 20   # conservative default (v7x per-TensorCore VMEM)


def _pick_batch_tile(batch, target=512):
    """Adaptive batch tile: minimal padding waste, even tile count for 2 TCs."""
    n_tiles = max(1, pl.cdiv(batch, target))
    if n_tiles == 1 and batch >= 2 * _SUBLANE:
        n_tiles = 2            # give both v7x TensorCores a tile
    elif n_tiles > 1 and n_tiles % 2 == 1:
        n_tiles += 1           # even tile count splits cleanly across 2 TCs
    return _round_up(pl.cdiv(batch, n_tiles), _SUBLANE)


def _pick_hidden_chunk(hid_p, target=512):
    """Largest multiple of 128 that divides hid_p and is <= target."""
    best = _LANE
    c = _LANE
    while c <= min(hid_p, max(target, _LANE)):
        if hid_p % c == 0:
            best = c
        c += _LANE
    return best


# --------------------------------------------------------------------------
# Forward pass
# --------------------------------------------------------------------------

def mlp_forward(x, w1t, b1r, w2t, b2r, out_dim, *, tm=None,
                force_tiled=False, hidden_chunk=None):
    """x: (B, input_dim) f32. Params from prepare_mlp_params. Returns (B, out_dim) f32."""
    batch, in_dim = x.shape
    assert w1t.shape[0] == in_dim, "x feature dim must match W1T rows"
    hid_p = w1t.shape[1]
    out_p = w2t.shape[1]
    wt_bytes = jnp.dtype(w1t.dtype).itemsize
    x_bytes = jnp.dtype(x.dtype).itemsize

    cap = _vmem_capacity_bytes()
    if tm is None:
        tm = _pick_batch_tile(batch)

    flops = 2 * batch * (in_dim * hid_p + hid_p * out_p)
    transcendentals = batch * (hid_p + out_p)            # one tanh per element

    # Resident-weight working set (worst case: weights still double-buffered
    # if the single-buffer request isn't honoured by this build).
    weight_bytes = (in_dim * hid_p + hid_p * out_p) * wt_bytes + (hid_p + out_p) * 4
    resident_budget = (2 * tm * in_dim * x_bytes + 2 * tm * out_p * 4
                       + 2 * weight_bytes
                       + tm * hid_p * 6 + tm * out_p * 4
                       + (2 << 20))
    use_tiled = force_tiled or resident_budget > int(0.8 * cap)

    if not use_tiled:
        grid_b = pl.cdiv(batch, tm)
        vmem_limit = int(min(max(resident_budget, 32 << 20), int(0.85 * cap)))
        cost = pl.CostEstimate(
            flops=flops,
            transcendentals=transcendentals,
            bytes_accessed=(x.size * x_bytes
                            + (w1t.size + w2t.size) * wt_bytes
                            + (b1r.size + b2r.size) * 4
                            + batch * out_p * 4),
        )

        def call(single_buffer_weights):
            wkw = ({"pipeline_mode": pl.Buffered(1)}
                   if single_buffer_weights else {})
            return pl.pallas_call(
                _mlp_kernel_resident,
                out_shape=jax.ShapeDtypeStruct((batch, out_p), jnp.float32),
                grid_spec=pltpu.PrefetchScalarGridSpec(
                    num_scalar_prefetch=0,
                    grid=(grid_b,),
                    in_specs=[
                        pl.BlockSpec((tm, in_dim), lambda i: (i, 0)),        # x streamed
                        pl.BlockSpec((in_dim, hid_p), lambda i: (0, 0), **wkw),
                        pl.BlockSpec((1, hid_p), lambda i: (0, 0), **wkw),
                        pl.BlockSpec((hid_p, out_p), lambda i: (0, 0), **wkw),
                        pl.BlockSpec((1, out_p), lambda i: (0, 0), **wkw),
                    ],
                    out_specs=pl.BlockSpec((tm, out_p), lambda i: (i, 0)),   # lane-dense
                ),
                compiler_params=pltpu.CompilerParams(
                    dimension_semantics=("parallel",),   # v7x: shard tiles over 2 TCs
                    vmem_limit_bytes=vmem_limit,
                ),
                cost_estimate=cost,
            )(x, w1t, b1r, w2t, b2r)

        try:
            out = call(True)
        except Exception:
            # pipeline_mode single-buffering rejected by this build -> default specs.
            out = call(False)
        return out[:, :out_dim]

    # ---------------- hidden-chunk-tiled fallback (v7x / very wide MLPs) ----------
    th = hidden_chunk if hidden_chunk is not None else _pick_hidden_chunk(hid_p)
    assert hid_p % th == 0 and th % _LANE == 0, "hidden chunk must divide padded hidden"

    def tiled_budget(tm_):
        return (2 * tm_ * in_dim * x_bytes + 2 * tm_ * out_p * 4
                + 2 * ((in_dim * th + th * out_p) * wt_bytes + (th + out_p) * 4)
                + tm_ * th * 6 + tm_ * out_p * 4
                + (2 << 20))

    # Shrink the batch tile until the tiled working set fits comfortably (v7x).
    while tm > _SUBLANE and tiled_budget(tm) > int(0.8 * cap):
        tm = _round_up(tm // 2, _SUBLANE)

    grid_b = pl.cdiv(batch, tm)
    grid = (grid_b, hid_p // th)
    vmem_limit = int(min(max(tiled_budget(tm), 32 << 20), int(0.85 * cap)))
    cost = pl.CostEstimate(
        flops=flops,
        transcendentals=transcendentals,
        bytes_accessed=(x.size * x_bytes
                        + grid_b * ((w1t.size + w2t.size) * wt_bytes
                                    + (b1r.size + b2r.size) * 4)
                        + batch * out_p * 4),
    )

    out = pl.pallas_call(
        _mlp_kernel_tiled,
        out_shape=jax.ShapeDtypeStruct((batch, out_p), jnp.float32),
        grid_spec=pltpu.PrefetchScalarGridSpec(
            num_scalar_prefetch=0,
            grid=grid,
            in_specs=[
                pl.BlockSpec((tm, in_dim), lambda i, k: (i, 0)),   # reused across k
                pl.BlockSpec((in_dim, th), lambda i, k: (0, k)),   # W1T hidden chunk
                pl.BlockSpec((1, th), lambda i, k: (0, k)),        # b1 chunk
                pl.BlockSpec((th, out_p), lambda i, k: (k, 0)),    # W2T hidden chunk
                pl.BlockSpec((1, out_p), lambda i, k: (0, 0)),     # b2 resident
            ],
            out_specs=pl.BlockSpec((tm, out_p), lambda i, k: (i, 0)),
            scratch_shapes=[pltpu.VMEM((tm, out_p), jnp.float32)],  # layer-2 accumulator
        ),
        compiler_params=pltpu.CompilerParams(
            dimension_semantics=("parallel", "arbitrary"),
            vmem_limit_bytes=vmem_limit,
        ),
        cost_estimate=cost,
    )(x, w1t, b1r, w2t, b2r)
    return out[:, :out_dim]


# --------------------------------------------------------------------------
# Demo / self-check
# --------------------------------------------------------------------------

def _init_linear(key, in_features, out_features):
    # Matches nn.Linear's default U(-1/sqrt(fan_in), 1/sqrt(fan_in)).
    kw, kb = jax.random.split(key)
    bound = 1.0 / jnp.sqrt(jnp.float32(in_features))
    w = jax.random.uniform(kw, (out_features, in_features), jnp.float32, -bound, bound)
    b = jax.random.uniform(kb, (out_features,), jnp.float32, -bound, bound)
    return w, b


def _reference(x, w1, b1, w2, b2):
    return jax.nn.sigmoid(jax.nn.sigmoid(x @ w1.T + b1) @ w2.T + b2)


if __name__ == "__main__":
    key = jax.random.PRNGKey(0)
    k_x, k_l1, k_l2, k_l3, k_l4 = jax.random.split(key, 5)

    batch, input_dim, hidden_dim, output_dim = 8, 4, 32, 2
    x = jax.random.normal(k_x, (batch, input_dim), jnp.float32)

    # --- resident-weight fast path (demo sizes) ---
    w1, b1 = _init_linear(k_l1, input_dim, hidden_dim)
    w2, b2 = _init_linear(k_l2, hidden_dim, output_dim)
    params = prepare_mlp_params(w1, b1, w2, b2)
    out = jax.block_until_ready(mlp_forward(x, *params))
    ref = _reference(x, w1, b1, w2, b2)
    assert out.shape == (batch, output_dim)
    # bf16 MXU operands => loosened tolerance vs the f32 reference.
    assert jnp.allclose(out, ref, atol=2e-2), "resident path mismatch vs reference"

    # --- hidden-chunk-tiled fallback path (the v7x VMEM-fit path), forced ---
    hidden_dim2 = 200                          # pads to 256 -> two 128-wide chunks
    w1b, b1b = _init_linear(k_l3, input_dim, hidden_dim2)
    w2b, b2b = _init_linear(k_l4, hidden_dim2, output_dim)
    params2 = prepare_mlp_params(w1b, b1b, w2b, b2b)
    out2 = jax.block_until_ready(
        mlp_forward(x, *params2, force_tiled=True, hidden_chunk=128))
    ref2 = _reference(x, w1b, b1b, w2b, b2b)
    assert out2.shape == (batch, output_dim)
    assert jnp.allclose(out2, ref2, atol=2e-2), "tiled path mismatch vs reference"

    print("KERNEL_OK")
</pallas_src>

<mosaic_0001>
module attributes {stable_mosaic.version = 11 : i64} {
  func.func @_mlp_kernel_resident(%arg0: i32, %arg1: memref<8x4xf32, #tpu.memory_space<vmem>>, %arg2: memref<4x128xbf16, #tpu.memory_space<vmem>>, %arg3: memref<1x128xf32, #tpu.memory_space<vmem>>, %arg4: memref<128x128xbf16, #tpu.memory_space<vmem>>, %arg5: memref<1x128xf32, #tpu.memory_space<vmem>>, %arg6: memref<8x128xf32, #tpu.memory_space<vmem>>) attributes {dimension_semantics = [#tpu.dimension_semantics<parallel>], iteration_bounds = array<i64: 1>, scalar_prefetch = 0 : i64, scratch_operands = 0 : i64, tpu.core_type = #tpu.core_type<tc>, window_params = [{transform_indices = @transform_0, window_bounds = array<i64: 8, 4>}, {pipeline_mode = #tpu.pipeline_mode<synchronous>, transform_indices = @transform_1, window_bounds = array<i64: 4, 128>}, {pipeline_mode = #tpu.pipeline_mode<synchronous>, transform_indices = @transform_2, window_bounds = array<i64: 1, 128>}, {pipeline_mode = #tpu.pipeline_mode<synchronous>, transform_indices = @transform_3, window_bounds = array<i64: 128, 128>}, {pipeline_mode = #tpu.pipeline_mode<synchronous>, transform_indices = @transform_4, window_bounds = array<i64: 1, 128>}, {transform_indices = @transform_5, window_bounds = array<i64: 8, 128>}]} {
    %c0 = arith.constant 0 : index
    %c0_0 = arith.constant 0 : index
    %0 = vector.load %arg1[%c0, %c0_0] : memref<8x4xf32, #tpu.memory_space<vmem>>, vector<8x4xf32>
    %1 = arith.truncf %0 : vector<8x4xf32> to vector<8x4xbf16>
    %c0_1 = arith.constant 0 : index
    %c0_2 = arith.constant 0 : index
    %2 = vector.load %arg2[%c0_1, %c0_2] : memref<4x128xbf16, #tpu.memory_space<vmem>>, vector<4x128xbf16>
    %cst = arith.constant dense<0.000000e+00> : vector<8x128xf32>
    %3 = tpu.matmul %1, %2, %cst {dimension_numbers = #tpu.dot_dimension_numbers<[1], [0], [0], [1], [0, 0, 1, 1], [], []>} : vector<8x4xbf16>, vector<4x128xbf16>, vector<8x128xf32> -> vector<8x128xf32>
    %c0_3 = arith.constant 0 : index
    %c0_4 = arith.constant 0 : index
    %4 = vector.load %arg3[%c0_3, %c0_4] : memref<1x128xf32, #tpu.memory_space<vmem>>, vector<1x128xf32>
    %5 = vector.broadcast %4 : vector<1x128xf32> to vector<8x128xf32>
    %6 = arith.addf %3, %5 : vector<8x128xf32>
    %cst_5 = arith.constant 5.000000e-01 : f32
    %7 = vector.broadcast %cst_5 : f32 to vector<8x128xf32>
    %8 = arith.mulf %7, %6 : vector<8x128xf32>
    %9 = math.tanh %8 : vector<8x128xf32>
    %cst_6 = arith.constant 5.000000e-01 : f32
    %10 = vector.broadcast %cst_6 : f32 to vector<8x128xf32>
    %11 = arith.mulf %10, %9 : vector<8x128xf32>
    %cst_7 = arith.constant 5.000000e-01 : f32
    %12 = vector.broadcast %cst_7 : f32 to vector<8x128xf32>
    %13 = arith.addf %11, %12 : vector<8x128xf32>
    %14 = arith.truncf %13 : vector<8x128xf32> to vector<8x128xbf16>
    %c0_8 = arith.constant 0 : index
    %c0_9 = arith.constant 0 : index
    %15 = vector.load %arg4[%c0_8, %c0_9] : memref<128x128xbf16, #tpu.memory_space<vmem>>, vector<128x128xbf16>
    %cst_10 = arith.constant dense<0.000000e+00> : vector<8x128xf32>
    %16 = tpu.matmul %14, %15, %cst_10 {dimension_numbers = #tpu.dot_dimension_numbers<[1], [0], [0], [1], [0, 0, 1, 1], [], []>} : vector<8x128xbf16>, vector<128x128xbf16>, vector<8x128xf32> -> vector<8x128xf32>
    %c0_11 = arith.constant 0 : index
    %c0_12 = arith.constant 0 : index
    %17 = vector.load %arg5[%c0_11, %c0_12] : memref<1x128xf32, #tpu.memory_space<vmem>>, vector<1x128xf32>
    %18 = vector.broadcast %17 : vector<1x128xf32> to vector<8x128xf32>
    %19 = arith.addf %16, %18 : vector<8x128xf32>
    %cst_13 = arith.constant 5.000000e-01 : f32
    %20 = vector.broadcast %cst_13 : f32 to vector<8x128xf32>
    %21 = arith.mulf %20, %19 : vector<8x128xf32>
    %22 = math.tanh %21 : vector<8x128xf32>
    %cst_14 = arith.constant 5.000000e-01 : f32
    %23 = vector.broadcast %cst_14 : f32 to vector<8x128xf32>
    %24 = arith.mulf %23, %22 : vector<8x128xf32>
    %cst_15 = arith.constant 5.000000e-01 : f32
    %25 = vector.broadcast %cst_15 : f32 to vector<8x128xf32>
    %26 = arith.addf %24, %25 : vector<8x128xf32>
    %c0_16 = arith.constant 0 : index
    %c0_17 = arith.constant 0 : index
    %27 = vector.load %arg6[%c0_16, %c0_17] : memref<8x128xf32, #tpu.memory_space<vmem>>, vector<8x128xf32>
    tpu.vector_store %arg6[%c0_16, %c0_17], %26 {strides = array<i32>} : memref<8x128xf32, #tpu.memory_space<vmem>>, vector<8x128xf32>,
    return
  }
  func.func @transform_0(%arg0: i32) -> (i32, i32) {
    %c0_i32 = arith.constant 0 : i32
    %c0_i32_0 = arith.constant 0 : i32
    return %arg0, %c0_i32 : i32, i32
  }
  func.func @transform_1(%arg0: i32) -> (i32, i32) {
    %c0_i32 = arith.constant 0 : i32
    %c0_i32_0 = arith.constant 0 : i32
    %c0_i32_1 = arith.constant 0 : i32
    return %c0_i32, %c0_i32_0 : i32, i32
  }
  func.func @transform_2(%arg0: i32) -> (i32, i32) {
    %c0_i32 = arith.constant 0 : i32
    %c0_i32_0 = arith.constant 0 : i32
    %c0_i32_1 = arith.constant 0 : i32
    return %c0_i32, %c0_i32_0 : i32, i32
  }
  func.func @transform_3(%arg0: i32) -> (i32, i32) {
    %c0_i32 = arith.constant 0 : i32
    %c0_i32_0 = arith.constant 0 : i32
    %c0_i32_1 = arith.constant 0 : i32
    return %c0_i32, %c0_i32_0 : i32, i32
  }
  func.func @transform_4(%arg0: i32) -> (i32, i32) {
    %c0_i32 = arith.constant 0 : i32
    %c0_i32_0 = arith.constant 0 : i32
    %c0_i32_1 = arith.constant 0 : i32
    return %c0_i32, %c0_i32_0 : i32, i32
  }
  func.func @transform_5(%arg0: i32) -> (i32, i32) {
    %c0_i32 = arith.constant 0 : i32
    %c0_i32_0 = arith.constant 0 : i32
    return %arg0, %c0_i32 : i32, i32
  }
}

module attributes {stable_mosaic.version = 11 : i64} {
  func.func @_mlp_kernel_resident(%arg0: i32, %arg1: memref<8x4xf32, #tpu.memory_space<vmem>>, %arg2: memref<4x128xbf16, #tpu.memory_space<vmem>>, %arg3: memref<1x128xf32, #tpu.memory_space<vmem>>, %arg4: memref<128x128xbf16, #tpu.memory_space<vmem>>, %arg5: memref<1x128xf32, #tpu.memory_space<vmem>>, %arg6: memref<8x128xf32, #tpu.memory_space<vmem>>) attributes {dimension_semantics = [#tpu.dimension_semantics<parallel>], iteration_bounds = array<i64: 1>, scalar_prefetch = 0 : i64, scratch_operands = 0 : i64, tpu.core_type = #tpu.core_type<tc>, window_params = [{transform_indices = @transform_0, window_bounds = array<i64: 8, 4>}, {pipeline_mode = #tpu.pipeline_mode<synchronous>, transform_indices = @transform_1, window_bounds = array<i64: 4, 128>}, {pipeline_mode = #tpu.pipeline_mode<synchronous>, transform_indices = @transform_2, window_bounds = array<i64: 1, 128>}, {pipeline_mode = #tpu.pipeline_mode<synchronous>, transform_indices = @transform_3, window_bounds = array<i64: 128, 128>}, {pipeline_mode = #tpu.pipeline_mode<synchronous>, transform_indices = @transform_4, window_bounds = array<i64: 1, 128>}, {transform_indices = @transform_5, window_bounds = array<i64: 8, 128>}]} {
    %c0 = arith.constant 0 : index
    %c0_0 = arith.constant 0 : index
    %0 = vector.load %arg1[%c0, %c0_0] : memref<8x4xf32, #tpu.memory_space<vmem>>, vector<8x4xf32>
    %1 = arith.truncf %0 : vector<8x4xf32> to vector<8x4xbf16>
    %c0_1 = arith.constant 0 : index
    %c0_2 = arith.constant 0 : index
    %2 = vector.load %arg2[%c0_1, %c0_2] : memref<4x128xbf16, #tpu.memory_space<vmem>>, vector<4x128xbf16>
    %cst = arith.constant dense<0.000000e+00> : vector<8x128xf32>
    %3 = tpu.matmul %1, %2, %cst {dimension_numbers = #tpu.dot_dimension_numbers<[1], [0], [0], [1], [0, 0, 1, 1], [], []>} : vector<8x4xbf16>, vector<4x128xbf16>, vector<8x128xf32> -> vector<8x128xf32>
    %c0_3 = arith.constant 0 : index
    %c0_4 = arith.constant 0 : index
    %4 = vector.load %arg3[%c0_3, %c0_4] : memref<1x128xf32, #tpu.memory_space<vmem>>, vector<1x128xf32>
    %5 = vector.broadcast %4 : vector<1x128xf32> to vector<8x128xf32>
    %6 = arith.addf %3, %5 : vector<8x128xf32>
    %cst_5 = arith.constant 5.000000e-01 : f32
    %7 = vector.broadcast %cst_5 : f32 to vector<8x128xf32>
    %8 = arith.mulf %7, %6 : vector<8x128xf32>
    %9 = math.tanh %8 : vector<8x128xf32>
    %cst_6 = arith.constant 5.000000e-01 : f32
    %10 = vector.broadcast %cst_6 : f32 to vector<8x128xf32>
    %11 = arith.mulf %10, %9 : vector<8x128xf32>
    %cst_7 = arith.constant 5.000000e-01 : f32
    %12 = vector.broadcast %cst_7 : f32 to vector<8x128xf32>
    %13 = arith.addf %11, %12 : vector<8x128xf32>
    %14 = arith.truncf %13 : vector<8x128xf32> to vector<8x128xbf16>
    %c0_8 = arith.constant 0 : index
    %c0_9 = arith.constant 0 : index
    %15 = vector.load %arg4[%c0_8, %c0_9] : memref<128x128xbf16, #tpu.memory_space<vmem>>, vector<128x128xbf16>
    %cst_10 = arith.constant dense<0.000000e+00> : vector<8x128xf32>
    %16 = tpu.matmul %14, %15, %cst_10 {dimension_numbers = #tpu.dot_dimension_numbers<[1], [0], [0], [1], [0, 0, 1, 1], [], []>} : vector<8x128xbf16>, vector<128x128xbf16>, vector<8x128xf32> -> vector<8x128xf32>
    %c0_11 = arith.constant 0 : index
    %c0_12 = arith.constant 0 : index
    %17 = vector.load %arg5[%c0_11, %c0_12] : memref<1x128xf32, #tpu.memory_space<vmem>>, vector<1x128xf32>
    %18 = vector.broadcast %17 : vector<1x128xf32> to vector<8x128xf32>
    %19 = arith.addf %16, %18 : vector<8x128xf32>
    %cst_13 = arith.constant 5.000000e-01 : f32
    %20 = vector.broadcast %cst_13 : f32 to vector<8x128xf32>
    %21 = arith.mulf %20, %19 : vector<8x128xf32>
    %22 = math.tanh %21 : vector<8x128xf32>
    %cst_14 = arith.constant 5.000000e-01 : f32
    %23 = vector.broadcast %cst_14 : f32 to vector<8x128xf32>
    %24 = arith.mulf %23, %22 : vector<8x128xf32>
    %cst_15 = arith.constant 5.000000e-01 : f32
    %25 = vector.broadcast %cst_15 : f32 to vector<8x128xf32>
    %26 = arith.addf %24, %25 : vector<8x128xf32>
    %c0_16 = arith.constant 0 : index
    %c0_17 = arith.constant 0 : index
    %27 = vector.load %arg6[%c0_16, %c0_17] : memref<8x128xf32, #tpu.memory_space<vmem>>, vector<8x128xf32>
    tpu.vector_store %arg6[%c0_16, %c0_17], %26 {strides = array<i32>} : memref<8x128xf32, #tpu.memory_space<vmem>>, vector<8x128xf32>,
    return
  }
  func.func @transform_0(%arg0: i32) -> (i32, i32) {
    %c0_i32 = arith.constant 0 : i32
    %c0_i32_0 = arith.constant 0 : i32
    return %arg0, %c0_i32 : i32, i32
  }
  func.func @transform_1(%arg0: i32) -> (i32, i32) {
    %c0_i32 = arith.constant 0 : i32
    %c0_i32_0 = arith.constant 0 : i32
    %c0_i32_1 = arith.constant 0 : i32
    return %c0_i32, %c0_i32_0 : i32, i32
  }
  func.func @transform_2(%arg0: i32) -> (i32, i32) {
    %c0_i32 = arith.constant 0 : i32
    %c0_i32_0 = arith.constant 0 : i32
    %c0_i32_1 = arith.constant 0 : i32
    return %c0_i32, %c0_i32_0 : i32, i32
  }
  func.func @transform_3(%arg0: i32) -> (i32, i32) {
    %c0_i32 = arith.constant 0 : i32
    %c0_i32_0 = arith.constant 0 : i32
    %c0_i32_1 = arith.constant 0 : i32
    return %c0_i32, %c0_i32_0 : i32, i32
  }
  func.func @transform_4(%arg0: i32) -> (i32, i32) {
    %c0_i32 = arith.constant 0 : i32
    %c0_i32_0 = arith.constant 0 : i32
    %c0_i32_1 = arith.constant 0 : i32
    return %c0_i32, %c0_i32_0 : i32, i32
  }
  func.func @transform_5(%arg0: i32) -> (i32, i32) {
    %c0_i32 = arith.constant 0 : i32
    %c0_i32_0 = arith.constant 0 : i32
    return %arg0, %c0_i32 : i32, i32
  }
}

</mosaic_0001>

<bundles_post_ra>
// kernel: tpu_custom_call.1
= control target key start
LH: loop header
LB: loop body
LE: loop exit
PB: predicated region body
PF: predicated region fallthrough
CT: control target
= control target key end

     0   :  { %10 = vsyncpa [#allocation3], 0  ;;  %s394_s0 = inlined_call_operand.vmem [shape: f32[8,4], index: 0, kind: input, shape index: {}]   ;;  %s395_s1 = inlined_call_operand.vmem [shape: bf16[4,128], index: 1, kind: input, shape index: {}]   ;;  %s396_s2 = inlined_call_operand.vmem [shape: f32[1,128], index: 2, kind: input, shape index: {}]   ;;  %s397_s3 = inlined_call_operand.hbm [shape: bf16[128,128], index: 3, kind: input, shape index: {}]   ;;  %s398_s4 = inlined_call_operand.vmem [shape: f32[1,128], index: 4, kind: input, shape index: {}]   ;;  %s399_s5 = inlined_call_operand.hbm [shape: f32[8,128], index: 5, kind: output, shape index: {}]  }
   0x1   :  { %11 = vsyncpa [#allocation4], 0  ;;  %s340_s18 = smov [#allocation2]  }
   0x2   :  { %s23_s19 = sshll.u32 %s340_s18, 4  ;;  %s24_s19 = int_to_ptr.vmem [resolvable:$true] %s23_s19 }
   0x3   :  { %s304_s20 = scalar_lea.vmem %s24_s19, 1024  ;;  %p309_p1 = scmp.lt.s32.totalorder %s24_s19, %s24_s19 }
   0x4   :  { %p305_p0 = scmp.ne.s32.totalorder %s24_s19, %s304_s20  ;;  %p310_p2 = scmp.lt.s32.totalorder %s304_s20, %s304_s20 }
   0x6   :  { %p311_p3 = por %p310_p2, %p309_p1 }
   0x8   :  { %p312_p4 = pnand %p311_p3, %p305_p0 }
   0xa   :  { %315 = shalt.err (!%p312_p4)
}
   0xb   :  { %s341_s21 = smov 64   ;;  %s342_s22 = smov 4  }
   0xc   :  { %29 = dma.hbm_to_vmem [thread:$0]  %s397_s3, 1024, %s24_s19, [#allocation3], %s341_s21, %s341_s21, %s342_s22  }
   0xd   :  { %336 = dma.done.wait [#allocation3], 1024  }
   0xe   :  { %337 = vsyncadd [#allocation3], 4294966272  ;;  %v343_v0 = vmov 0.0   ;;  %vm344_vm0 = vmmov 0   ;;  %vm50_vm1 = vcmask 1041408   ;;  %v36_v2 = vld [vmem:[%s394_s0] sm:$0xff] }
   0xf   :  { %252 = vmatprep.subr.bf16.mxu0 %v343_v0  ;;  %254 = vmatprep.mubr.msk.bf16.mxu0 %vm344_vm0, %v343_v0  ;;  %v38_v1 = vld [vmem:[%s395_s1] sm:$0x3]  ;;  %v37_v4 = vpack.c.bf16 %v36_v2, %v36_v2  ;;  %v284_v5 = vld [vmem:[#allocation2 + $0x38] sm:$0xff]   ;;  %vm46_vm2 = vcmask 31744   ;;  %v285_v6 = vld [vmem:[#allocation2 + $0x30] sm:$0xff]  }
  0x10   :  { %258 = vmatprep.subr.bf16.mxu1 %v343_v0  ;;  %274 = vmatprep.mubr.msk.bf16.mxu1 %vm344_vm0, %v343_v0  ;;  %v52_v3 = vsel %vm50_vm1, %v38_v1, 0  ;;  %v286_v7 = vld [vmem:[#allocation2 + $0x28] sm:$0xff]   ;;  %v287_v8 = vld [vmem:[#allocation2 + $0x20] sm:$0xff]   ;;  %v288_v9 = vld [vmem:[#allocation2 + $0x18] sm:$0xff]  }
  0x11   :  { %253 = vmatpush3.bf16.msra.mxu0 %v52_v3  ;;  %259 = vmatpush3.bf16.msra.mxu1 %v284_v5  ;;  %v289_v10 = vld [vmem:[#allocation2 + $0x10] sm:$0xff]   ;;  %v290_v11 = vld [vmem:[#allocation2 + $0x8] sm:$0xff]   ;;  %v291_v12 = vld [vmem:[#allocation2] sm:$0xff]  }
  0x12   :  { %260 = vmatprep.subr.bf16.mxu1 %v343_v0  ;;  %v230_v13 = vld [vmem:[%s396_s2] ss:$0 sm:$0xff]  ;;  %s345_s2 = smov [#allocation5]  }
  0x13   :  { %v232_v24 = vld [vmem:[%s398_s4] ss:$0 sm:$0xff]  ;;  %s221_s30 = sshll.u32 %s345_s2, 4  ;;  %s222_s30 = int_to_ptr.vmem [resolvable:$true] %s221_s30 }
  0x14   :  { %255 = vmatmul.mubr.msk.bf16.vlgmr.msra.gmra.mxu0 %vm46_vm2, %v37_v4  ;;  %s316_s6 = scalar_lea.vmem %s222_s30, 128  ;;  %p321_p6 = scmp.lt.s32.totalorder %s222_s30, %s222_s30 }
  0x15   :  { %261 = vmatpush3.bf16.msra.mxu1 %v285_v6  ;;  %p317_p5 = scmp.ne.s32.totalorder %s222_s30, %s316_s6  ;;  %p322_p7 = scmp.lt.s32.totalorder %s316_s6, %s316_s6 }
  0x16   :  { %262 = vmatprep.subr.bf16.mxu1 %v343_v0 }
  0x17   :  { %p323_p8 = por %p322_p7, %p321_p6 }
  0x19   :  { %263 = vmatpush3.bf16.msra.mxu1 %v286_v7  ;;  %p324_p9 = pnand %p323_p8, %p317_p5 }
  0x1a   :  { %264 = vmatprep.subr.bf16.mxu1 %v343_v0 }
  0x1d   :  { %265 = vmatpush3.bf16.msra.mxu1 %v287_v8 }
  0x1e   :  { %266 = vmatprep.subr.bf16.mxu1 %v343_v0 }
  0x21   :  { %267 = vmatpush3.bf16.msra.mxu1 %v288_v9 }
  0x22   :  { %268 = vmatprep.subr.bf16.mxu1 %v343_v0 }
  0x25   :  { %269 = vmatpush3.bf16.msra.mxu1 %v289_v10 }
  0x26   :  { %270 = vmatprep.subr.bf16.mxu1 %v343_v0 }
  0x29   :  { %271 = vmatpush3.bf16.msra.mxu1 %v290_v11 }
  0x2a   :  { %272 = vmatprep.subr.bf16.mxu1 %v343_v0 }
  0x2d   :  { %273 = vmatpush3.bf16.msra.mxu1 %v291_v12 }
  0xd4   :  { %v88_v14 = vpop.f32.mrf.mxu0 }
  0xd5   :  { %v89_v15 = vadd.f32 %v230_v13, %v88_v14 }
  0xd6   :  { %v256_v16 = vpop.f32.mrf.mxu0 }
  0xd7   :  { %v94_v17 = vmul.f32 0.5, %v89_v15 }
  0xd8   :  { %v91_v18 = vpop.f32.mrf.mxu0 }
  0xd9   :  { %292 = vtanh.f32 %v94_v17 }
  0xda   :  { %v257_v19 = vpop.f32.mrf.mxu0 }
  0xe6   :  { %v293_v20 = vpop.eup %292 }
  0xe7   :  { %v96_v21 = vmul.f32 0.5, %v293_v20 }
  0xe9   :  { %v97_v22 = vadd.f32 0.5, %v96_v21 }
  0xeb   :  { %v98_v23 = vpack.c.bf16 %v97_v22, %v97_v22 }
  0xed   :  { %275 = vmatmul.mubr.bf16.vlgmr.msra.gmra.mxu1 %v98_v23 }
 0x1ad   :  { %v204_v25 = vpop.f32.mrf.mxu1 }
 0x1ae   :  { %v205_v26 = vadd.f32 %v232_v24, %v204_v25 }
 0x1af   :  { %v276_v27 = vpop.f32.mrf.mxu1 }
 0x1b0   :  { %v210_v28 = vmul.f32 0.5, %v205_v26 }
 0x1b1   :  { %v207_v29 = vpop.f32.mrf.mxu1 }
 0x1b2   :  { %294 = vtanh.f32 %v210_v28 }
 0x1b3   :  { %v277_v30 = vpop.f32.mrf.mxu1 }
 0x1bf   :  { %v295_v31 = vpop.eup %294 }
 0x1c0   :  { %v212_v32 = vmul.f32 0.5, %v295_v31 }
 0x1c2   :  { %v213_v33 = vadd.f32 0.5, %v212_v32 }
 0x1c4   :  { %214 = vst [vmem:[#allocation5] sm:$0xff] %v213_v33 }
 0x1c5   :  { %327 = shalt.err (!%p324_p9)
}
 0x1c6   :  { %224 = dma.vmem_to_hbm [thread:$0]  %s222_s30, 128, %s399_s5, [#allocation4]  }
 0x1c7   :  { %338 = dma.done.wait [#allocation4], 128  }
 0x1c8   :  { %339 = vsyncadd [#allocation4], 4294967168 }
 0x1c9   :  { %228 = vsyncpa [#allocation3], 1 }
 0x1ca   :  { %229 = vsyncpa [#allocation4], 1 }

// kernel: tpu_custom_call.1
= control target key start
LH: loop header
LB: loop body
LE: loop exit
PB: predicated region body
PF: predicated region fallthrough
CT: control target
= control target key end

     0   :  { %10 = vsyncpa [#allocation3], 0  ;;  %s394_s0 = inlined_call_operand.vmem [shape: f32[8,4], index: 0, kind: input, shape index: {}]   ;;  %s395_s1 = inlined_call_operand.vmem [shape: bf16[4,128], index: 1, kind: input, shape index: {}]   ;;  %s396_s2 = inlined_call_operand.vmem [shape: f32[1,128], index: 2, kind: input, shape index: {}]   ;;  %s397_s3 = inlined_call_operand.hbm [shape: bf16[128,128], index: 3, kind: input, shape index: {}]   ;;  %s398_s4 = inlined_call_operand.vmem [shape: f32[1,128], index: 4, kind: input, shape index: {}]   ;;  %s399_s5 = inlined_call_operand.hbm [shape: f32[8,128], index: 5, kind: output, shape index: {}]  }
   0x1   :  { %11 = vsyncpa [#allocation4], 0  ;;  %s340_s18 = smov [#allocation2]  }
   0x2   :  { %s23_s19 = sshll.u32 %s340_s18, 4  ;;  %s24_s19 = int_to_ptr.vmem [resolvable:$true] %s23_s19 }
   0x3   :  { %s304_s20 = scalar_lea.vmem %s24_s19, 1024  ;;  %p309_p1 = scmp.lt.s32.totalorder %s24_s19, %s24_s19 }
   0x4   :  { %p305_p0 = scmp.ne.s32.totalorder %s24_s19, %s304_s20  ;;  %p310_p2 = scmp.lt.s32.totalorder %s304_s20, %s304_s20 }
   0x6   :  { %p311_p3 = por %p310_p2, %p309_p1 }
   0x8   :  { %p312_p4 = pnand %p311_p3, %p305_p0 }
   0xa   :  { %315 = shalt.err (!%p312_p4)
}
   0xb   :  { %s341_s21 = smov 64   ;;  %s342_s22 = smov 4  }
   0xc   :  { %29 = dma.hbm_to_vmem [thread:$0]  %s397_s3, 1024, %s24_s19, [#allocation3], %s341_s21, %s341_s21, %s342_s22  }
   0xd   :  { %336 = dma.done.wait [#allocation3], 1024  }
   0xe   :  { %337 = vsyncadd [#allocation3], 4294966272  ;;  %v343_v0 = vmov 0.0   ;;  %vm344_vm0 = vmmov 0   ;;  %vm50_vm1 = vcmask 1041408   ;;  %v36_v2 = vld [vmem:[%s394_s0] sm:$0xff] }
   0xf   :  { %252 = vmatprep.subr.bf16.mxu0 %v343_v0  ;;  %254 = vmatprep.mubr.msk.bf16.mxu0 %vm344_vm0, %v343_v0  ;;  %v38_v1 = vld [vmem:[%s395_s1] sm:$0x3]  ;;  %v37_v4 = vpack.c.bf16 %v36_v2, %v36_v2  ;;  %v284_v5 = vld [vmem:[#allocation2 + $0x38] sm:$0xff]   ;;  %vm46_vm2 = vcmask 31744   ;;  %v285_v6 = vld [vmem:[#allocation2 + $0x30] sm:$0xff]  }
  0x10   :  { %258 = vmatprep.subr.bf16.mxu1 %v343_v0  ;;  %274 = vmatprep.mubr.msk.bf16.mxu1 %vm344_vm0, %v343_v0  ;;  %v52_v3 = vsel %vm50_vm1, %v38_v1, 0  ;;  %v286_v7 = vld [vmem:[#allocation2 + $0x28] sm:$0xff]   ;;  %v287_v8 = vld [vmem:[#allocation2 + $0x20] sm:$0xff]   ;;  %v288_v9 = vld [vmem:[#allocation2 + $0x18] sm:$0xff]  }
  0x11   :  { %253 = vmatpush3.bf16.msra.mxu0 %v52_v3  ;;  %259 = vmatpush3.bf16.msra.mxu1 %v284_v5  ;;  %v289_v10 = vld [vmem:[#allocation2 + $0x10] sm:$0xff]   ;;  %v290_v11 = vld [vmem:[#allocation2 + $0x8] sm:$0xff]   ;;  %v291_v12 = vld [vmem:[#allocation2] sm:$0xff]  }
  0x12   :  { %260 = vmatprep.subr.bf16.mxu1 %v343_v0  ;;  %v230_v13 = vld [vmem:[%s396_s2] ss:$0 sm:$0xff]  ;;  %s345_s2 = smov [#allocation5]  }
  0x13   :  { %v232_v24 = vld [vmem:[%s398_s4] ss:$0 sm:$0xff]  ;;  %s221_s30 = sshll.u32 %s345_s2, 4  ;;  %s222_s30 = int_to_ptr.vmem [resolvable:$true] %s221_s30 }
  0x14   :  { %255 = vmatmul.mubr.msk.bf16.vlgmr.msra.gmra.mxu0 %vm46_vm2, %v37_v4  ;;  %s316_s6 = scalar_lea.vmem %s222_s30, 128  ;;  %p321_p6 = scmp.lt.s32.totalorder %s222_s30, %s222_s30 }
  0x15   :  { %261 = vmatpush3.bf16.msra.mxu1 %v285_v6  ;;  %p317_p5 = scmp.ne.s32.totalorder %s222_s30, %s316_s6  ;;  %p322_p7 = scmp.lt.s32.totalorder %s316_s6, %s316_s6 }
  0x16   :  { %262 = vmatprep.subr.bf16.mxu1 %v343_v0 }
  0x17   :  { %p323_p8 = por %p322_p7, %p321_p6 }
  0x19   :  { %263 = vmatpush3.bf16.msra.mxu1 %v286_v7  ;;  %p324_p9 = pnand %p323_p8, %p317_p5 }
  0x1a   :  { %264 = vmatprep.subr.bf16.mxu1 %v343_v0 }
  0x1d   :  { %265 = vmatpush3.bf16.msra.mxu1 %v287_v8 }
  0x1e   :  { %266 = vmatprep.subr.bf16.mxu1 %v343_v0 }
  0x21   :  { %267 = vmatpush3.bf16.msra.mxu1 %v288_v9 }
  0x22   :  { %268 = vmatprep.subr.bf16.mxu1 %v343_v0 }
  0x25   :  { %269 = vmatpush3.bf16.msra.mxu1 %v289_v10 }
  0x26   :  { %270 = vmatprep.subr.bf16.mxu1 %v343_v0 }
  0x29   :  { %271 = vmatpush3.bf16.msra.mxu1 %v290_v11 }
  0x2a   :  { %272 = vmatprep.subr.bf16.mxu1 %v343_v0 }
  0x2d   :  { %273 = vmatpush3.bf16.msra.mxu1 %v291_v12 }
  0xd4   :  { %v88_v14 = vpop.f32.mrf.mxu0 }
  0xd5   :  { %v89_v15 = vadd.f32 %v230_v13, %v88_v14 }
  0xd6   :  { %v256_v16 = vpop.f32.mrf.mxu0 }
  0xd7   :  { %v94_v17 = vmul.f32 0.5, %v89_v15 }
  0xd8   :  { %v91_v18 = vpop.f32.mrf.mxu0 }
  0xd9   :  { %292 = vtanh.f32 %v94_v17 }
  0xda   :  { %v257_v19 = vpop.f32.mrf.mxu0 }
  0xe6   :  { %v293_v20 = vpop.eup %292 }
  0xe7   :  { %v96_v21 = vmul.f32 0.5, %v293_v20 }
  0xe9   :  { %v97_v22 = vadd.f32 0.5, %v96_v21 }
  0xeb   :  { %v98_v23 = vpack.c.bf16 %v97_v22, %v97_v22 }
  0xed   :  { %275 = vmatmul.mubr.bf16.vlgmr.msra.gmra.mxu1 %v98_v23 }
 0x1ad   :  { %v204_v25 = vpop.f32.mrf.mxu1 }
 0x1ae   :  { %v205_v26 = vadd.f32 %v232_v24, %v204_v25 }
 0x1af   :  { %v276_v27 = vpop.f32.mrf.mxu1 }
 0x1b0   :  { %v210_v28 = vmul.f32 0.5, %v205_v26 }
 0x1b1   :  { %v207_v29 = vpop.f32.mrf.mxu1 }
 0x1b2   :  { %294 = vtanh.f32 %v210_v28 }
 0x1b3   :  { %v277_v30 = vpop.f32.mrf.mxu1 }
 0x1bf   :  { %v295_v31 = vpop.eup %294 }
 0x1c0   :  { %v212_v32 = vmul.f32 0.5, %v295_v31 }
 0x1c2   :  { %v213_v33 = vadd.f32 0.5, %v212_v32 }
 0x1c4   :  { %214 = vst [vmem:[#allocation5] sm:$0xff] %v213_v33 }
 0x1c5   :  { %327 = shalt.err (!%p324_p9)
}
 0x1c6   :  { %224 = dma.vmem_to_hbm [thread:$0]  %s222_s30, 128, %s399_s5, [#allocation4]  }
 0x1c7   :  { %338 = dma.done.wait [#allocation4], 128  }
 0x1c8   :  { %339 = vsyncadd [#allocation4], 4294967168 }
 0x1c9   :  { %228 = vsyncpa [#allocation3], 1 }
 0x1ca   :  { %229 = vsyncpa [#allocation4], 1 }

</bundles_post_ra>
